<compile_context>
chip_gen: v5e
topology: v5e:2x2
jax: 0.10.0
libtpu: 0.0.40
codegen_flags: <defaults>
</compile_context>

<pallas_src>
import functools

import jax
import jax.numpy as jnp
from jax.experimental import pallas as pl
from jax.experimental.pallas import tpu as pltpu

LANE = 128
SUB = 16                      # sublane multiple for block rows (covers f32 and bf16 x)
MAX_BLOCK_ROWS = 8192         # 8192 x 128 x 4 B = 4 MiB per f32 input block
VMEM_LIMIT_BYTES = 40 * 1024 * 1024   # 2 inputs x 2 bufs x 4 MiB = 16 MiB + headroom


def _round_up(x, m):
    return (x + m - 1) // m * m


def _num_parallel_ranges():
    """2-way 'parallel' row split only on v7x (2 TensorCores/chip); 1 elsewhere."""
    try:
        kind = jax.devices()[0].device_kind.lower()
    except Exception:
        return 1
    return 2 if ("v7" in kind or "tpu7" in kind) else 1


def _content_loss_kernel(x_ref, t_ref, partial_ref, *,
                         weight, rows_alloc, block_rows, inner, has_tail):
    p = pl.program_id(0)       # parallel row-range index
    i = pl.program_id(1)       # reduction step within the range

    @pl.when(i == 0)
    def _():
        partial_ref[...] = jnp.zeros_like(partial_ref)

    x = x_ref[...].astype(jnp.float32)
    diff = x * weight - t_ref[...]          # t_ref already holds target * weight (f32)
    sq = diff * diff

    def _accumulate(vals):
        # (block_rows,128) -> (block_rows//8, 8, 128) regroups whole (8,128) vregs,
        # so the axis-0 sum is an in-register VPU add tree (no XLU, no VMEM copy).
        partial_ref[...] += jnp.sum(vals.reshape(block_rows // 8, 8, LANE), axis=0)

    if not has_tail:
        # Every block is fully in-bounds: unmasked fast path only.
        _accumulate(sq)
    else:
        row0 = (p * inner + i) * block_rows
        is_tail = row0 + block_rows > rows_alloc

        @pl.when(jnp.logical_not(is_tail))
        def _():
            _accumulate(sq)

        @pl.when(is_tail)
        def _():
            # Only the single partial tail block pays for the mask.
            row_idx = row0 + jax.lax.broadcasted_iota(jnp.int32, (block_rows, LANE), 0)
            _accumulate(jnp.where(row_idx < rows_alloc, sq, 0.0))


def make_content_loss(target, weight):
    """Mimics Content_Loss.__init__: precompute target*weight, return forward fn."""
    target = jnp.asarray(target)
    orig_shape = target.shape
    numel = int(target.size)

    rows = pl.cdiv(numel, LANE)
    rows_alloc = max(rows, SUB)                    # pad tiny tensors up to one block
    pad_elems = rows_alloc * LANE - numel          # 0 whenever numel % 128 == 0 (common)

    # target * weight, kept as an f32 lane-dense slab.
    t_w = (jnp.asarray(target, jnp.float32) * jnp.float32(weight)).reshape(-1)
    if pad_elems:
        t_w = jnp.pad(t_w, (0, pad_elems))         # zero pad contributes 0 to the sum
    t_w = t_w.reshape(rows_alloc, LANE)

    # Largest sublane-aligned block that does not exceed the slab (<= MAX_BLOCK_ROWS).
    block_rows = min(MAX_BLOCK_ROWS, (rows_alloc // SUB) * SUB)
    nblocks = pl.cdiv(rows_alloc, block_rows)

    # 2-way parallel split only where it helps (v7x), and only when it divides evenly
    # so no clamped overflow block is ever DMA'd.
    num_par = _num_parallel_ranges()
    if num_par > 1:
        if nblocks < num_par:
            num_par = 1
        elif nblocks % num_par:
            nb_target = _round_up(nblocks, num_par)
            br = _round_up(pl.cdiv(rows_alloc, nb_target), SUB)
            nb = pl.cdiv(rows_alloc, br)
            if nb % num_par == 0:
                block_rows, nblocks = br, nb
            else:
                num_par = 1
    inner = nblocks // num_par
    has_tail = (rows_alloc % block_rows) != 0

    def row_map(p, i):
        return (p * inner + i, 0)

    kernel = functools.partial(
        _content_loss_kernel,
        weight=float(weight), rows_alloc=rows_alloc, block_rows=block_rows,
        inner=inner, has_tail=has_tail)

    call = pl.pallas_call(
        kernel,
        out_shape=jax.ShapeDtypeStruct((num_par * 8, LANE), jnp.float32),
        grid_spec=pltpu.PrefetchScalarGridSpec(
            num_scalar_prefetch=0,
            grid=(num_par, inner),
            in_specs=[
                pl.BlockSpec((block_rows, LANE), row_map),   # input x (native dtype)
                pl.BlockSpec((block_rows, LANE), row_map),   # target * weight (f32)
            ],
            out_specs=pl.BlockSpec((8, LANE), lambda p, i: (p, 0)),
        ),
        compiler_params=pltpu.CompilerParams(
            dimension_semantics=("parallel", "arbitrary"),
            vmem_limit_bytes=VMEM_LIMIT_BYTES,
        ),
    )

    @jax.jit
    def _fwd(x, t2d):
        # No dtype cast here: x streams through HBM in its native dtype and is
        # upcast to f32 inside the kernel (in VMEM).
        x_flat = x.reshape(-1)
        if pad_elems:
            # Rare fallback; zero padding contributes 0 (0*w - 0 = 0).
            x_flat = jnp.pad(x_flat, (0, pad_elems))
        partials = call(x_flat.reshape(rows_alloc, LANE), t2d)
        loss = jnp.sum(partials) / jnp.float32(numel)
        # out = input.clone(): JAX arrays are immutable, returning x is equivalent.
        return x, loss

    def forward(x):
        assert x.shape == orig_shape, f"expected {orig_shape}, got {x.shape}"
        return _fwd(x, t_w)

    return forward


if __name__ == "__main__":
    key = jax.random.PRNGKey(0)
    k_t, k_x = jax.random.split(key)

    # Small NCHW shapes consistent with a conv feature map.
    N, C, H, W = 2, 4, 16, 16
    weight = 0.75

    target = jax.random.normal(k_t, (N, C, H, W), dtype=jnp.float32)
    x = jax.random.normal(k_x, (N, C, H, W), dtype=jnp.float32)

    content_loss = make_content_loss(target, weight)
    out, loss = content_loss(x)
    out, loss = jax.block_until_ready((out, loss))

    # Pure-JAX reference check of forward semantics.
    ref_loss = jnp.mean((x * weight - target * weight) ** 2)
    assert jnp.allclose(out, x, atol=1e-6), "clone/output mismatch"
    assert jnp.allclose(loss, ref_loss, rtol=1e-5, atol=1e-6), "MSE loss mismatch"

    print("KERNEL_OK")
</pallas_src>

<mosaic_0001>
module attributes {stable_mosaic.version = 11 : i64} {
  func.func @_content_loss_kernel(%arg0: i32, %arg1: i32, %arg2: memref<16x128xf32, #tpu.memory_space<vmem>>, %arg3: memref<16x128xf32, #tpu.memory_space<vmem>>, %arg4: memref<8x128xf32, #tpu.memory_space<vmem>>) attributes {dimension_semantics = [#tpu.dimension_semantics<parallel>, #tpu.dimension_semantics<arbitrary>], iteration_bounds = array<i64: 1, 1>, scalar_prefetch = 0 : i64, scratch_operands = 0 : i64, tpu.core_type = #tpu.core_type<tc>, window_params = [{transform_indices = @transform_0, window_bounds = array<i64: 16, 128>}, {transform_indices = @transform_1, window_bounds = array<i64: 16, 128>}, {transform_indices = @transform_2, window_bounds = array<i64: 8, 128>}]} {
    %c0_i32 = arith.constant 0 : i32
    %0 = arith.cmpi eq, %arg1, %c0_i32 : i32
    %1 = arith.extui %0 : i1 to i32
    %c0_i32_0 = arith.constant 0 : i32
    %2 = arith.cmpi ne, %1, %c0_i32_0 : i32
    scf.if %2 {
      %cst_9 = arith.constant 0.000000e+00 : f32
      %14 = vector.broadcast %cst_9 : f32 to vector<8x128xf32>
      %c0_10 = arith.constant 0 : index
      %c0_11 = arith.constant 0 : index
      %15 = vector.load %arg4[%c0_10, %c0_11] : memref<8x128xf32, #tpu.memory_space<vmem>>, vector<8x128xf32>
      tpu.vector_store %arg4[%c0_10, %c0_11], %14 {strides = array<i32>} : memref<8x128xf32, #tpu.memory_space<vmem>>, vector<8x128xf32>,
    } else {
    }
    %c0 = arith.constant 0 : index
    %c0_1 = arith.constant 0 : index
    %3 = vector.load %arg2[%c0, %c0_1] : memref<16x128xf32, #tpu.memory_space<vmem>>, vector<16x128xf32>
    %cst = arith.constant 7.500000e-01 : f32
    %4 = vector.broadcast %cst : f32 to vector<16x128xf32>
    %5 = arith.mulf %3, %4 : vector<16x128xf32>
    %c0_2 = arith.constant 0 : index
    %c0_3 = arith.constant 0 : index
    %6 = vector.load %arg3[%c0_2, %c0_3] : memref<16x128xf32, #tpu.memory_space<vmem>>, vector<16x128xf32>
    %7 = arith.subf %5, %6 : vector<16x128xf32>
    %8 = arith.mulf %7, %7 : vector<16x128xf32>
    %c0_4 = arith.constant 0 : index
    %c0_5 = arith.constant 0 : index
    %9 = vector.load %arg4[%c0_4, %c0_5] : memref<8x128xf32, #tpu.memory_space<vmem>>, vector<8x128xf32>
    %10 = vector.shape_cast %8 : vector<16x128xf32> to vector<2x8x128xf32>
    %cst_6 = arith.constant dense<0.000000e+00> : vector<8x128xf32>
    %11 = vector.multi_reduction <add>, %10, %cst_6 [0] : vector<2x8x128xf32> to vector<8x128xf32>
    %12 = arith.addf %9, %11 : vector<8x128xf32>
    %c0_7 = arith.constant 0 : index
    %c0_8 = arith.constant 0 : index
    %13 = vector.load %arg4[%c0_7, %c0_8] : memref<8x128xf32, #tpu.memory_space<vmem>>, vector<8x128xf32>
    tpu.vector_store %arg4[%c0_7, %c0_8], %12 {strides = array<i32>} : memref<8x128xf32, #tpu.memory_space<vmem>>, vector<8x128xf32>,
    return
  }
  func.func @transform_0(%arg0: i32, %arg1: i32) -> (i32, i32) {
    %c1_i32 = arith.constant 1 : i32
    %0 = arith.muli %arg0, %c1_i32 : i32
    %1 = arith.addi %0, %arg1 : i32
    %c0_i32 = arith.constant 0 : i32
    %c0_i32_0 = arith.constant 0 : i32
    return %1, %c0_i32 : i32, i32
  }
  func.func @transform_1(%arg0: i32, %arg1: i32) -> (i32, i32) {
    %c1_i32 = arith.constant 1 : i32
    %0 = arith.muli %arg0, %c1_i32 : i32
    %1 = arith.addi %0, %arg1 : i32
    %c0_i32 = arith.constant 0 : i32
    %c0_i32_0 = arith.constant 0 : i32
    return %1, %c0_i32 : i32, i32
  }
  func.func @transform_2(%arg0: i32, %arg1: i32) -> (i32, i32) {
    %c0_i32 = arith.constant 0 : i32
    %c0_i32_0 = arith.constant 0 : i32
    return %arg0, %c0_i32 : i32, i32
  }
}

</mosaic_0001>

<bundles_post_ra>
// kernel: _fwd.1
= control target key start
LH: loop header
LB: loop body
LE: loop exit
PB: predicated region body
PF: predicated region fallthrough
CT: control target
= control target key end

     0   :  { %s121_s0 = inlined_call_operand.vmem [shape: f32[16,128], index: 0, kind: input, shape index: {}]   ;;  %s122_s1 = inlined_call_operand.vmem [shape: f32[16,128], index: 1, kind: input, shape index: {}]   ;;  %s123_s2 = inlined_call_operand.vmem [shape: f32[8,128], index: 2, kind: output, shape index: {}]  }
   0x1   :  { %v60_v0 = vld [vmem:[%s121_s0] sm:$0xff]  ;;  %v61_v1 = vld [vmem:[%s121_s0 + $0x8] sm:$0xff] }
   0x2   :  { %v64_v2 = vld [vmem:[%s122_s1] sm:$0xff]  ;;  %v62_v3 = vmul.f32 0.75, %v60_v0  ;;  %v63_v4 = vmul.f32 0.75, %v61_v1  ;;  %v65_v5 = vld [vmem:[%s122_s1 + $0x8] sm:$0xff] }
   0x4   :  { %v66_v6 = vsub.f32 %v62_v3, %v64_v2  ;;  %v67_v7 = vsub.f32 %v63_v4, %v65_v5 }
   0x6   :  { %v68_v8 = vmul.f32 %v66_v6, %v66_v6  ;;  %v69_v9 = vmul.f32 %v67_v7, %v67_v7 }
   0x8   :  { %v71_v10 = vadd.f32 %v69_v9, %v68_v8 }
   0xa   :  { %73 = vst [vmem:[%s123_s2] sm:$0xff] %v71_v10 }

</bundles_post_ra>
